<compile_context>
chip_gen: v6e
topology: v6e:2x2x1
jax: 0.10.0
libtpu: 0.0.40
codegen_flags: <defaults>
</compile_context>

<pallas_src>
import jax
import jax.numpy as jnp
from jax.experimental import pallas as pl
from jax.experimental.pallas import tpu as pltpu


def _make_pad_kernel(k: int, H: int, W: int, Ho: int, Wo: int):
    """Kernel: build the padded (Cblk, Ho, Wo) tile in registers, store once."""

    def pad_kernel(x_ref, o_ref):
        x = x_ref[...]                                   # (Cblk, H, W)
        cb = x.shape[0]
        dt = x.dtype
        hz = jnp.zeros((cb, k, W), dt)                   # top / bottom zero rows
        mid = jnp.concatenate([hz, x, hz], axis=1)       # (Cblk, Ho, W)
        wz = jnp.zeros((cb, Ho, k), dt)                  # left / right zero cols
        padded = jnp.concatenate([wz, mid, wz], axis=2)  # (Cblk, Ho, Wo)
        # TODO(synk): a non-Identity elementwise `op` would be applied to
        # `padded` here, fused before the single store.
        o_ref[...] = padded                              # one aligned store

    return pad_kernel


def _choose_block_channels(n_ch: int, Ho: int, Wo: int, itemsize: int,
                           target_bytes: int = 4 << 20) -> int:
    """Largest divisor of n_ch whose output block stays <= target_bytes,
    preferring a split that leaves >= 2 grid steps (megacore sharding)."""
    per_ch = max(1, Ho * Wo * itemsize)
    max_c = max(1, target_bytes // per_ch)
    best = 1
    best_any = 1
    for d in range(1, n_ch + 1):
        if n_ch % d != 0 or d > max_c:
            continue
        best_any = max(best_any, d)
        if n_ch > 1 and n_ch // d < 2:
            continue
        best = max(best, d)
    # If no divisor leaves >= 2 steps (e.g. n_ch == 1), fall back to the
    # largest fitting divisor.
    return best if best > 1 or n_ch == 1 else max(best, best_any if n_ch == 1 else best)


def padding_forward(x: jax.Array, k: int) -> jax.Array:
    """Equivalent of Padding(k, op=nn.Identity()).forward(x) for NCHW x."""
    if k == 0:
        return x  # identity: nothing to pad

    B, C, H, W = x.shape
    Ho, Wo = H + 2 * k, W + 2 * k
    BC = B * C

    # Collapse batch and channel so each grid step moves a large contiguous
    # slab instead of a ~1 KiB (1,1,H,W) tile.
    xr = x.reshape(BC, H, W)
    cblk = _choose_block_channels(BC, Ho, Wo, x.dtype.itemsize)
    grid = (BC // cblk,)

    out = pl.pallas_call(
        _make_pad_kernel(k, H, W, Ho, Wo),
        out_shape=jax.ShapeDtypeStruct((BC, Ho, Wo), x.dtype),
        grid=grid,
        in_specs=[pl.BlockSpec((cblk, H, W), lambda i: (i, 0, 0))],
        out_specs=pl.BlockSpec((cblk, Ho, Wo), lambda i: (i, 0, 0)),
        compiler_params=pltpu.CompilerParams(
            dimension_semantics=("parallel",),
            # Plenty for double-buffered ~4 MiB in/out blocks; safe on
            # v5e / v6e (128 MiB physical) and v7x (64 MiB physical).
            vmem_limit_bytes=32 << 20,
        ),
    )(xr)

    # op = nn.Identity() -> no-op at the JAX level.
    return out.reshape(B, C, Ho, Wo)


if __name__ == "__main__":
    key = jax.random.PRNGKey(0)
    B, C, H, W = 2, 4, 16, 16
    k = 2

    x = jax.random.normal(key, (B, C, H, W), dtype=jnp.float32)

    y = padding_forward(x, k)
    y = jax.block_until_ready(y)

    # Reference: same semantics as F.pad(x, (k, k, k, k)) with zeros.
    y_ref = jnp.pad(x, ((0, 0), (0, 0), (k, k), (k, k)))
    assert y.shape == (B, C, H + 2 * k, W + 2 * k), y.shape
    assert jnp.array_equal(y, y_ref), "mismatch vs reference zero-pad"

    print("KERNEL_OK")
</pallas_src>

<mosaic_0001>
module attributes {stable_mosaic.version = 11 : i64} {
  func.func @pad_kernel(%arg0: i32, %arg1: memref<4x16x16xf32, #tpu.memory_space<vmem>>, %arg2: memref<4x20x20xf32, #tpu.memory_space<vmem>>) attributes {dimension_semantics = [#tpu.dimension_semantics<parallel>], iteration_bounds = array<i64: 2>, scalar_prefetch = 0 : i64, scratch_operands = 0 : i64, tpu.core_type = #tpu.core_type<tc>, window_params = [{transform_indices = @transform_0, window_bounds = array<i64: 4, 16, 16>}, {transform_indices = @transform_1, window_bounds = array<i64: 4, 20, 20>}]} {
    %c0 = arith.constant 0 : index
    %c0_0 = arith.constant 0 : index
    %c0_1 = arith.constant 0 : index
    %0 = vector.load %arg1[%c0, %c0_0, %c0_1] : memref<4x16x16xf32, #tpu.memory_space<vmem>>, vector<4x16x16xf32>
    %cst = arith.constant 0.000000e+00 : f32
    %1 = vector.broadcast %cst : f32 to vector<4x2x16xf32>
    %2 = tpu.concatenate %1, %0, %1 in 1 : vector<4x2x16xf32>, vector<4x16x16xf32>, vector<4x2x16xf32> -> vector<4x20x16xf32>
    %cst_2 = arith.constant 0.000000e+00 : f32
    %3 = vector.broadcast %cst_2 : f32 to vector<4x20x2xf32>
    %4 = tpu.concatenate %3, %2, %3 in 2 : vector<4x20x2xf32>, vector<4x20x16xf32>, vector<4x20x2xf32> -> vector<4x20x20xf32>
    %c0_3 = arith.constant 0 : index
    %c0_4 = arith.constant 0 : index
    %c0_5 = arith.constant 0 : index
    %5 = vector.load %arg2[%c0_3, %c0_4, %c0_5] : memref<4x20x20xf32, #tpu.memory_space<vmem>>, vector<4x20x20xf32>
    tpu.vector_store %arg2[%c0_3, %c0_4, %c0_5], %4 {strides = array<i32>} : memref<4x20x20xf32, #tpu.memory_space<vmem>>, vector<4x20x20xf32>,
    return
  }
  func.func @transform_0(%arg0: i32) -> (i32, i32, i32) {
    %c0_i32 = arith.constant 0 : i32
    %c0_i32_0 = arith.constant 0 : i32
    %c0_i32_1 = arith.constant 0 : i32
    return %arg0, %c0_i32, %c0_i32_0 : i32, i32, i32
  }
  func.func @transform_1(%arg0: i32) -> (i32, i32, i32) {
    %c0_i32 = arith.constant 0 : i32
    %c0_i32_0 = arith.constant 0 : i32
    %c0_i32_1 = arith.constant 0 : i32
    return %arg0, %c0_i32, %c0_i32_0 : i32, i32, i32
  }
}

</mosaic_0001>

<bundles_post_ra>
// kernel: tpu_custom_call.1
= control target key start
LH: loop header
LB: loop body
LE: loop exit
PB: predicated region body
PF: predicated region fallthrough
CT: control target
= control target key end

     0   :  { %6 = vsyncpa [#allocation3], 0  ;;  %s661_s0 = inlined_call_operand.hbm [shape: f32[8,16,16], index: 0, kind: input, shape index: {}]   ;;  %s662_s1 = inlined_call_operand.vmem [shape: f32[8,20,20], index: 1, kind: output, shape index: {}]  }
   0x1   :  { %8 = vsyncpa [#allocation3 + $0x1], 0  ;;  %s477_s6 = smov 0   ;;  %s479_s7 = smov 0  }
   0x2   :  { %s481_s8 = smov 0   ;;  %s483_s9 = smov 0  }
   0x3 LB: > { %s340_s10 = sadd.s32 4294967295, %s461_s9   ;;  %s497_s11 = sadd.s32 1, %s461_s9   ;;  %s461_s9 = sphi %s483_s9, %s671_s9   ;;  %s457_s8 = sphi %s481_s8, %s670_s8   ;;  %s453_s7 = sphi %s479_s7, %s669_s7   ;;  %s449_s6 = sphi %s477_s6, %s668_s6  }
   0x4   : > { %s18_s12 = ssub.s32 %s461_s9, %s497_s11  ;;  %s21_s13 = sadd.s32 1, %s457_s8 }
   0x5   : > { %p19_p0 = scmp.eq.s32.totalorder %s18_s12, 0  ;;  %p28_p1 = scmp.ne.s32.totalorder %s457_s8, %s453_s7 }
   0x6   : > { %p29_p2 = scmp.eq.s32.totalorder %s461_s9, 0  ;;  %p34_p3 = scmp.ne.s32.totalorder %s453_s7, %s449_s6 }
   0x7   : > { %s507_s14 = scalar_select %p19_p0, %s457_s8, %s21_s13  }
   0x8   : > { %p30_p4 = por %p29_p2, %p28_p1  ;;  %p35_p5 = scmp.eq.s32.totalorder %s340_s10, 0 }
   0x9   : > { %p363_p6 = scmp.lt.s32.totalorder %s461_s9, 2  ;;  %s84_s16 = sand.u32 1, %s457_s8  }
   0xa   : > { %p512_p7 = por %p35_p5, %p34_p3  ;;  %s344_s17 = sshll.u32 %s84_s16, 6 }
   0xb   : > { %s355_s18 = sshll.u32 %s461_s9, 10  ;;  %s88_s22 = scalar_lea.vmem [#allocation2], %s344_s17 }
   0xc   : > { %s664_s15 = scalar_select %p512_p7, 1, 0 }
   0xd   : > { %s521_s21 = scalar_lea.hbm %s661_s0, %s355_s18  ;;  %s96_s23 = sshll.u32 %s88_s22, 4  ;;  %s523_s23 = int_to_ptr.vmem [resolvable:$true] %s96_s23 }
   0xe   : > { %p525_p8 = pnand %p363_p6, %p30_p4  ;;  %s530_s25 = scalar_lea.sflag [#allocation3], %s84_s16 }
   0xf   : > { %s399_s26 = scalar_lea.hbm %s521_s21, 1024  ;;  %s404_s29 = scalar_lea.hbm %s661_s0, 2048 }
  0x10   : > { %p400_p10 = scmp.ne.s32.totalorder %s521_s21, %s399_s26  ;;  %p401_p11 = pneg %p525_p8 }
  0x11   : > { %p405_p0 = scmp.lt.s32.totalorder %s521_s21, %s661_s0  ;;  %p406_p1 = scmp.lt.s32.totalorder %s404_s29, %s399_s26 }
  0x12   : > { %p402_p12 = pnand %p401_p11, %p400_p10 }
  0x13   : > { %p407_p2 = por %p406_p1, %p405_p0 }
  0x14   : > { %p403_p13 = pneg %p402_p12 }
  0x16   : > { %p408_p3 = pnand %p407_p2, %p403_p13 }
  0x18   : > { %411 = shalt.err (!%p408_p3)
}
  0x19   : > { %s412_s3 = scalar_lea.vmem %s523_s23, 1024  ;;  %s463_s4 = smov [#allocation2]  }
  0x1a   : > { %p413_p4 = scmp.ne.s32.totalorder %s523_s23, %s412_s3  ;;  %s417_s5 = sshll.u32 %s463_s4, 4  ;;  %s418_s5 = int_to_ptr.vmem [resolvable:$false] %s417_s5 }
  0x1b   : > { %s419_s6 = scalar_lea.vmem %s418_s5, 2048  ;;  %p420_p10 = scmp.lt.s32.totalorder %s523_s23, %s418_s5 }
  0x1c   : > { %p415_p5 = pnand %p413_p4, %p401_p11  ;;  %p421_p12 = scmp.lt.s32.totalorder %s419_s6, %s412_s3 }
  0x1e   : > { %p416_p6 = pneg %p415_p5  ;;  %p422_p9 = por %p421_p12, %p420_p10 }
  0x20   : > { %p423_p7 = pnand %p422_p9, %p416_p6 }
  0x22   : > { %426 = shalt.err (!%p423_p7)
}
  0x23   : > { %s464_s12 = smov 128   ;;  %s465_s13 = smov 8  }
  0x24   : > { %362 = dma.hbm_to_vmem [thread:$0]  (!%p525_p8), %s521_s21, 1024, %s523_s23, %s530_s25, %s464_s12, %s464_s12, %s465_s13  }
  0x25   : > { %p104_p11 = scmp.lt.s32.totalorder %s461_s9, 3  ;;  %p666_p13 = scmp.ge.s32.totalorder %s461_s9, 1 }
  0x27   : > { %p105_p0 = pnand %p666_p13, %p104_p11 }
  0x28   : > { %s110_s16 = sand.u32 (!%p105_p0), 1, %s453_s7   ;;  %p667_p7 = scmp.ne.s32.totalorder (!%p105_p0), %s664_s15, 0 }
  0x29   : > { %108 = sbr.rel (%p105_p0) target bundleno = 190 (0xbe), region = 24  ;;  %s349_s17 = sshll.u32 (!%p105_p0), %s110_s16, 6 }
  0x2a   : > { %s111_s18 = scalar_lea.sflag (!%p105_p0), [#allocation3], %s110_s16  ;;  %s555_s19 = scalar_lea.vmem (!%p105_p0), [#allocation2], %s349_s17 }
  0x2e   : > { %444 = dma.done.wait (%p667_p7), %s111_s18, 1024  }
  0x2f   : > { %446 = vsyncadd (%p667_p7), %s111_s18, 4294966272  ;;  %v143_v0 = vld [vmem:[%s555_s19 + $0x8] sm:$0xff]  ;;  %vm158_vm0 = vcmask 1041408   ;;  %v142_v1 = vld [vmem:[%s555_s19] sm:$0xff]  ;;  %s466_s15 = smov 2   ;;  %s350_s20 = sshll.u32 %s340_s10, 2 }
  0x30   : > { %v144_v2 = vld [vmem:[%s555_s19 + $0x10] sm:$0xff]  ;;  %v160_v3 = vrot.slane %v143_v0, 6  ;;  %v159_v4 = vrot.slane %v142_v1, 6  ;;  %v145_v6 = vld [vmem:[%s555_s19 + $0x18] sm:$0xff]  ;;  %v146_v12 = vld [vmem:[%s555_s19 + $0x20] sm:$0xff]  ;;  %p136_p8 = scmp.lt.s32.totalorder %s350_s20, 7 }
  0x31   : > { %v162_v5 = vrot.slane %v144_v2, 6  ;;  %v163_v11 = vrot.slane %v145_v6, 6  ;;  %v147_v13 = vld [vmem:[%s555_s19 + $0x28] sm:$0xff]  ;;  %v165_v16 = vrot.slane %v146_v12, 6  ;;  %v148_v18 = vld [vmem:[%s555_s19 + $0x30] sm:$0xff]  ;;  %v149_v22 = vld [vmem:[%s555_s19 + $0x38] sm:$0xff] }
  0x32   : > { %v183_v7 = vsel %vm158_vm0, %v160_v3, 0.0  ;;  %v179_v8 = vsel %vm158_vm0, 0.0, %v159_v4  ;;  %v161_v10 = vsel %vm158_vm0, %v159_v4, %v160_v3  ;;  %v166_v17 = vrot.slane %v147_v13, 6  ;;  %s673_s20 = smov (!%p136_p8, %s350_s20), 7 }
  0x33   : > { %199 = vrot.lane.b32.xlu1 %v183_v7, %s466_s15  ;;  %195 = vrot.lane.b32.xlu0 %v179_v8, %s466_s15  ;;  %v180_v9 = vsel %vm158_vm0, 0.0, %v162_v5  ;;  %v184_v14 = vsel %vm158_vm0, %v163_v11, 0.0  ;;  %v164_v15 = vsel %vm158_vm0, %v162_v5, %v163_v11  ;;  %v181_v20 = vsel %vm158_vm0, 0.0, %v165_v16  ;;  %s356_s21 = smul.u32 24, %s673_s20 }
  0x34   : > { %v167_v19 = vsel %vm158_vm0, %v165_v16, %v166_v17  ;;  %v168_v21 = vrot.slane %v148_v18, 6  ;;  %v185_v24 = vsel %vm158_vm0, %v166_v17, 0.0  ;;  %v169_v25 = vrot.slane %v149_v22, 6 }
  0x35   : > { %vm231_vm1 = vcmask 15360   ;;  %vm244_vm2 = vcmask 146432   ;;  %s598_s24 = scalar_lea.vmem %s662_s1, %s356_s21  ;;  %vm260_vm3 = vcmask 158720   ;;  %vm257_vm4 = vcmask 162816  }
  0x36   : > { %v182_v23 = vsel %vm158_vm0, 0.0, %v168_v21  ;;  %v186_v26 = vsel %vm158_vm0, %v169_v25, 0.0  ;;  %v170_v27 = vsel %vm158_vm0, %v168_v21, %v169_v25 }
  0x37   : > { %201 = vrot.lane.b32.xlu1 %v180_v9, %s466_s15  ;;  %197 = vrot.lane.b32.xlu0 %v161_v10, %s466_s15 }
  0x3b   : > { %205 = vrot.lane.b32.xlu1 %v184_v14, %s466_s15  ;;  %203 = vrot.lane.b32.xlu0 %v164_v15, %s466_s15 }
  0x3f   : > { %209 = vrot.lane.b32.xlu1 %v167_v19, %s466_s15  ;;  %207 = vrot.lane.b32.xlu0 %v181_v20, %s466_s15 }
  0x43   : > { %213 = vrot.lane.b32.xlu1 %v182_v23, %s466_s15  ;;  %211 = vrot.lane.b32.xlu0 %v185_v24, %s466_s15 }
  0x47   : > { %217 = vrot.lane.b32.xlu1 %v186_v26, %s466_s15  ;;  %215 = vrot.lane.b32.xlu0 %v170_v27, %s466_s15 }
  0xa5   : > { %v200_v28 = vpop.permute.xlu1 %199  ;;  %v196_v29 = vpop.permute.xlu0 %195 }
  0xa6   : > { %v234_v30 = vsel %vm231_vm1, 0.0, %v200_v28  ;;  %v232_v31 = vsel %vm231_vm1, 0.0, %v196_v29 }
  0xa7   : > { %v247_v32 = vsel %vm244_vm2, %v234_v30, 0.0  ;;  %v245_v33 = vsel %vm244_vm2, %v232_v31, 0.0 }
  0xa8   : > { %261 = vst.msk [vmem:[%s598_s24 + $0x10] sm:$0xf] %vm260_vm3, %v247_v32 }
  0xa9   : > { %258 = vst.msk [vmem:[%s598_s24] sm:$0xff] %vm257_vm4, %v245_v33  ;;  %v202_v34 = vpop.permute.xlu1 %201  ;;  %v198_v35 = vpop.permute.xlu0 %197 }
  0xaa   : > { %v235_v36 = vsel %vm231_vm1, 0.0, %v202_v34  ;;  %v233_v37 = vsel %vm231_vm1, 0.0, %v198_v35 }
  0xab   : > { %v248_v38 = vsel %vm244_vm2, %v235_v36, 0.0  ;;  %v246_v39 = vsel %vm244_vm2, %v233_v37, 0.0 }
  0xac   : > { %262 = vst.msk [vmem:[%s598_s24 + $0x18] sm:$0xff] %vm257_vm4, %v248_v38  ;;  %259 = vst.msk [vmem:[%s598_s24 + $0x8] sm:$0xff] %vm257_vm4, %v246_v39 }
  0xad   : > { %v206_v40 = vpop.permute.xlu1 %205  ;;  %v204_v41 = vpop.permute.xlu0 %203 }
  0xae   : > { %v237_v42 = vsel %vm231_vm1, 0.0, %v206_v40  ;;  %v236_v43 = vsel %vm231_vm1, 0.0, %v204_v41 }
  0xaf   : > { %v250_v44 = vsel %vm244_vm2, %v237_v42, 0.0  ;;  %v249_v45 = vsel %vm244_vm2, %v236_v43, 0.0 }
  0xb0   : > { %264 = vst.msk [vmem:[%s598_s24 + $0x28] sm:$0xf] %vm260_vm3, %v250_v44 }
  0xb1   : > { %263 = vst.msk [vmem:[%s598_s24 + $0x20] sm:$0xff] %vm257_vm4, %v249_v45  ;;  %v210_v46 = vpop.permute.xlu1 %209  ;;  %v208_v47 = vpop.permute.xlu0 %207 }
  0xb2   : > { %v239_v48 = vsel %vm231_vm1, 0.0, %v210_v46  ;;  %v238_v49 = vsel %vm231_vm1, 0.0, %v208_v47 }
  0xb3   : > { %v252_v50 = vsel %vm244_vm2, %v239_v48, 0.0  ;;  %v251_v51 = vsel %vm244_vm2, %v238_v49, 0.0 }
  0xb4   : > { %266 = vst.msk [vmem:[%s598_s24 + $0x38] sm:$0xff] %vm257_vm4, %v252_v50  ;;  %265 = vst.msk [vmem:[%s598_s24 + $0x30] sm:$0xff] %vm257_vm4, %v251_v51 }
  0xb5   : > { %v214_v52 = vpop.permute.xlu1 %213  ;;  %v212_v53 = vpop.permute.xlu0 %211 }
  0xb6   : > { %v241_v54 = vsel %vm231_vm1, 0.0, %v214_v52  ;;  %v240_v55 = vsel %vm231_vm1, 0.0, %v212_v53 }
  0xb7   : > { %v254_v56 = vsel %vm244_vm2, %v241_v54, 0.0  ;;  %v253_v57 = vsel %vm244_vm2, %v240_v55, 0.0 }
  0xb8   : > { %268 = vst.msk [vmem:[%s598_s24 + $0x48] sm:$0xff] %vm257_vm4, %v254_v56 }
  0xb9   : > { %267 = vst.msk [vmem:[%s598_s24 + $0x40] sm:$0xf] %vm260_vm3, %v253_v57  ;;  %v218_v58 = vpop.permute.xlu1 %217  ;;  %v216_v59 = vpop.permute.xlu0 %215 }
  0xba   : > { %v243_v60 = vsel %vm231_vm1, 0.0, %v218_v58  ;;  %v242_v61 = vsel %vm231_vm1, 0.0, %v216_v59 }
  0xbb   : > { %v256_v62 = vsel %vm244_vm2, %v243_v60, 0.0  ;;  %v255_v63 = vsel %vm244_vm2, %v242_v61, 0.0 }
  0xbc   : > { %270 = vst.msk [vmem:[%s598_s24 + $0x58] sm:$0xf] %vm260_vm3, %v256_v62 }
  0xbd   : > { %269 = vst.msk [vmem:[%s598_s24 + $0x50] sm:$0xff] %vm257_vm4, %v255_v63 }
  0xbe PF: > { %p11_p9 = scmp.ge.s32.totalorder %s497_s11, 4   ;;  %s668_s6 = smov %s453_s7 }
  0xbf   : > { %s669_s7 = smov %s457_s8  ;;  %s670_s8 = smov %s507_s14 }
  0xc0   : > { %s671_s9 = smov %s497_s11  ;;  %13 = sbr.rel (!%p11_p9) target bundleno = 3 (0x3), region = 64 }
  0xc5   :  { %295 = vsyncpa [#allocation3], 1 }
  0xc6   :  { %297 = vsyncpa [#allocation3 + $0x1], 1 }

</bundles_post_ra>
